<compile_context>
chip_gen: v7x
topology: tpu7x:2x2x1
jax: 0.10.0
libtpu: 0.0.40
codegen_flags: <defaults>
</compile_context>

<pallas_src>
import jax
import jax.numpy as jnp
from jax.experimental import pallas as pl
from jax.experimental.pallas import tpu as pltpu

_LANES = 128
_BN_EPS = 1e-3


def _fc_bn_relu_kernel(x_ref, wt_ref, gamma_ref, beta_ref, o_ref):
    # x_ref:     [B, C_in]   bf16  (whole batch resident: BN stats need all rows)
    # wt_ref:    [C_in, TN]  bf16  (pre-transposed, lane-padded C_out tile)
    # gamma_ref: [1, TN]     f32
    # beta_ref:  [1, TN]     f32
    # o_ref:     [B, TN]     f32
    # Linear on the MXU (bf16 operands, f32 accumulation). No bias: it is
    # cancelled exactly by the batch-mean subtraction below.
    y = jnp.dot(x_ref[...], wt_ref[...], preferred_element_type=jnp.float32)

    # BatchNorm1d (training): batch mean + biased batch variance, eps=1e-3.
    # Two-pass (centered) variance for numerical robustness; tile is in VMEM
    # so the second pass costs nothing at these sizes.
    mean = jnp.mean(y, axis=0, keepdims=True)            # [1, TN]
    centered = y - mean                                   # [B, TN]
    var = jnp.mean(centered * centered, axis=0, keepdims=True)

    # Fold gamma into the rsqrt scale: one [B, TN] multiply instead of two.
    scale = jax.lax.rsqrt(var + _BN_EPS) * gamma_ref[...]
    o_ref[...] = jnp.maximum(centered * scale + beta_ref[...], 0.0)   # ReLU


def prepare_params(weight, bias, gamma, beta):
    """One-time parameter repack (run once, reuse across calls).

    weight: [C_out, C_in] (PyTorch layout); bias/gamma/beta: [C_out].
    Returns (wt_bf16 [C_in, C_pad], gamma_pad [1, C_pad], beta_pad [1, C_pad], C_out).
    """
    del bias  # training-mode BN subtracts the batch mean => fc bias cancels exactly
    C_out, C_in = weight.shape
    C_pad = ((C_out + _LANES - 1) // _LANES) * _LANES
    wt = jnp.zeros((C_in, C_pad), jnp.bfloat16).at[:, :C_out].set(
        weight.T.astype(jnp.bfloat16))
    g = jnp.zeros((1, C_pad), jnp.float32).at[:, :C_out].set(
        gamma.reshape(1, -1).astype(jnp.float32))
    bt = jnp.zeros((1, C_pad), jnp.float32).at[:, :C_out].set(
        beta.reshape(1, -1).astype(jnp.float32))
    return wt, g, bt, C_out


def basic_fc_bn(x, wt, g, bt, c_out, *, slice_output=True):
    """x: [B, C_in] f32; wt/g/bt from prepare_params()."""
    B, C_in = x.shape
    C_pad = wt.shape[1]

    # Lane-dense C_out tile: 256 lanes when divisible (v6e/v7x MXU width),
    # otherwise 128 (always divides C_pad, and matches v5e's 128-wide MXU).
    tn = 256 if (C_pad % 256 == 0) else _LANES
    grid = (C_pad // tn,)

    x_bf16 = x.astype(jnp.bfloat16)  # bf16 MXU operand; BN math stays f32 in-kernel

    cost = pl.CostEstimate(
        flops=2 * B * C_in * C_pad,
        transcendentals=C_pad,  # rsqrt per feature
        bytes_accessed=(x_bf16.size * 2 + wt.size * 2
                        + g.size * 4 + bt.size * 4 + B * C_pad * 4),
    )

    out_padded = pl.pallas_call(
        _fc_bn_relu_kernel,
        out_shape=jax.ShapeDtypeStruct((B, C_pad), jnp.float32),
        grid_spec=pltpu.PrefetchScalarGridSpec(
            num_scalar_prefetch=0,
            grid=grid,
            in_specs=[
                # Full batch resident every step (BN stats span all of B).
                pl.BlockSpec((B, C_in), lambda j: (0, 0)),
                pl.BlockSpec((C_in, tn), lambda j: (0, j)),
                pl.BlockSpec((1, tn), lambda j: (0, j)),
                pl.BlockSpec((1, tn), lambda j: (0, j)),
            ],
            out_specs=pl.BlockSpec((B, tn), lambda j: (0, j)),
        ),
        compiler_params=pltpu.CompilerParams(
            dimension_semantics=("parallel",)),  # C_out tiles are independent
        cost_estimate=cost,
    )(x_bf16, wt, g, bt)

    if slice_output:
        # NOTE: if the consumer can take the padded [B, C_pad] slab, pass
        # slice_output=False and avoid this extra XLA copy.
        return out_padded[:, :c_out]
    return out_padded


def reference(x, weight, bias, gamma, beta):
    # Full PyTorch-equivalent math in f32, *including* the fc bias, to show
    # that dropping it inside the kernel (training-mode BN) is exact.
    y = x @ weight.T + bias.reshape(1, -1)
    mean = jnp.mean(y, axis=0, keepdims=True)
    var = jnp.mean((y - mean) ** 2, axis=0, keepdims=True)
    y_hat = (y - mean) / jnp.sqrt(var + _BN_EPS)
    return jnp.maximum(y_hat * gamma.reshape(1, -1) + beta.reshape(1, -1), 0.0)


if __name__ == "__main__":
    B, C_in, C_out = 8, 32, 64

    key = jax.random.PRNGKey(0)
    k_x, k_w, k_b = jax.random.split(key, 3)

    x = jax.random.normal(k_x, (B, C_in), dtype=jnp.float32)

    # PyTorch-like uniform fan-in init for fc; BN gamma=1, beta=0 defaults.
    bound = 1.0 / jnp.sqrt(jnp.float32(C_in))
    weight = jax.random.uniform(k_w, (C_out, C_in), jnp.float32, -bound, bound)
    bias = jax.random.uniform(k_b, (C_out,), jnp.float32, -bound, bound)
    gamma = jnp.ones((C_out,), jnp.float32)
    beta = jnp.zeros((C_out,), jnp.float32)

    # One-time repack (hoisted out of the per-call path).
    wt, g, bt, c_out = prepare_params(weight, bias, gamma, beta)

    out = basic_fc_bn(x, wt, g, bt, c_out)
    out = jax.block_until_ready(out)

    ref = reference(x, weight, bias, gamma, beta)
    assert out.shape == (B, C_out)
    # bf16 MXU operands => loosened tolerance; BN renormalization keeps the
    # output O(1) so absolute error stays small.
    assert jnp.allclose(out, ref, atol=3e-2, rtol=3e-2), "mismatch vs reference"

    print("KERNEL_OK")
</pallas_src>

<mosaic_0001>
module attributes {stable_mosaic.version = 11 : i64} {
  func.func @_fc_bn_relu_kernel(%arg0: i32, %arg1: memref<8x32xbf16, #tpu.memory_space<vmem>>, %arg2: memref<32x128xbf16, #tpu.memory_space<vmem>>, %arg3: memref<1x128xf32, #tpu.memory_space<vmem>>, %arg4: memref<1x128xf32, #tpu.memory_space<vmem>>, %arg5: memref<8x128xf32, #tpu.memory_space<vmem>>) attributes {dimension_semantics = [#tpu.dimension_semantics<parallel>], iteration_bounds = array<i64: 1>, scalar_prefetch = 0 : i64, scratch_operands = 0 : i64, tpu.core_type = #tpu.core_type<tc>, window_params = [{pipeline_mode = #tpu.pipeline_mode<synchronous>, transform_indices = @transform_0, window_bounds = array<i64: 8, 32>}, {transform_indices = @transform_1, window_bounds = array<i64: 32, 128>}, {transform_indices = @transform_2, window_bounds = array<i64: 1, 128>}, {transform_indices = @transform_3, window_bounds = array<i64: 1, 128>}, {transform_indices = @transform_4, window_bounds = array<i64: 8, 128>}]} {
    %c0 = arith.constant 0 : index
    %c0_0 = arith.constant 0 : index
    %0 = vector.load %arg1[%c0, %c0_0] : memref<8x32xbf16, #tpu.memory_space<vmem>>, vector<8x32xbf16>
    %c0_1 = arith.constant 0 : index
    %c0_2 = arith.constant 0 : index
    %1 = vector.load %arg2[%c0_1, %c0_2] : memref<32x128xbf16, #tpu.memory_space<vmem>>, vector<32x128xbf16>
    %cst = arith.constant dense<0.000000e+00> : vector<8x128xf32>
    %2 = tpu.matmul %0, %1, %cst {dimension_numbers = #tpu.dot_dimension_numbers<[1], [0], [0], [1], [0, 0, 1, 1], [], []>} : vector<8x32xbf16>, vector<32x128xbf16>, vector<8x128xf32> -> vector<8x128xf32>
    %cst_3 = arith.constant dense<0.000000e+00> : vector<128xf32>
    %3 = vector.multi_reduction <add>, %2, %cst_3 [0] : vector<8x128xf32> to vector<128xf32>
    %4 = vector.shape_cast %3 : vector<128xf32> to vector<1x128xf32>
    %cst_4 = arith.constant 8.000000e+00 : f32
    %5 = vector.broadcast %cst_4 : f32 to vector<1x128xf32>
    %6 = arith.divf %4, %5 : vector<1x128xf32>
    %7 = vector.broadcast %6 : vector<1x128xf32> to vector<8x128xf32>
    %8 = arith.subf %2, %7 : vector<8x128xf32>
    %9 = arith.mulf %8, %8 : vector<8x128xf32>
    %cst_5 = arith.constant dense<0.000000e+00> : vector<128xf32>
    %10 = vector.multi_reduction <add>, %9, %cst_5 [0] : vector<8x128xf32> to vector<128xf32>
    %11 = vector.shape_cast %10 : vector<128xf32> to vector<1x128xf32>
    %cst_6 = arith.constant 8.000000e+00 : f32
    %12 = vector.broadcast %cst_6 : f32 to vector<1x128xf32>
    %13 = arith.divf %11, %12 : vector<1x128xf32>
    %cst_7 = arith.constant 1.000000e-03 : f32
    %14 = vector.broadcast %cst_7 : f32 to vector<1x128xf32>
    %15 = arith.addf %13, %14 : vector<1x128xf32>
    %16 = math.rsqrt %15 : vector<1x128xf32>
    %c0_8 = arith.constant 0 : index
    %c0_9 = arith.constant 0 : index
    %17 = vector.load %arg3[%c0_8, %c0_9] : memref<1x128xf32, #tpu.memory_space<vmem>>, vector<1x128xf32>
    %18 = arith.mulf %16, %17 : vector<1x128xf32>
    %19 = vector.broadcast %18 : vector<1x128xf32> to vector<8x128xf32>
    %20 = arith.mulf %8, %19 : vector<8x128xf32>
    %c0_10 = arith.constant 0 : index
    %c0_11 = arith.constant 0 : index
    %21 = vector.load %arg4[%c0_10, %c0_11] : memref<1x128xf32, #tpu.memory_space<vmem>>, vector<1x128xf32>
    %22 = vector.broadcast %21 : vector<1x128xf32> to vector<8x128xf32>
    %23 = arith.addf %20, %22 : vector<8x128xf32>
    %cst_12 = arith.constant 0.000000e+00 : f32
    %24 = vector.broadcast %cst_12 : f32 to vector<8x128xf32>
    %25 = arith.maximumf %23, %24 : vector<8x128xf32>
    %c0_13 = arith.constant 0 : index
    %c0_14 = arith.constant 0 : index
    %26 = vector.load %arg5[%c0_13, %c0_14] : memref<8x128xf32, #tpu.memory_space<vmem>>, vector<8x128xf32>
    tpu.vector_store %arg5[%c0_13, %c0_14], %25 {strides = array<i32>} : memref<8x128xf32, #tpu.memory_space<vmem>>, vector<8x128xf32>,
    return
  }
  func.func @transform_0(%arg0: i32) -> (i32, i32) {
    %c0_i32 = arith.constant 0 : i32
    %c0_i32_0 = arith.constant 0 : i32
    %c0_i32_1 = arith.constant 0 : i32
    return %c0_i32, %c0_i32_0 : i32, i32
  }
  func.func @transform_1(%arg0: i32) -> (i32, i32) {
    %c0_i32 = arith.constant 0 : i32
    %c0_i32_0 = arith.constant 0 : i32
    return %c0_i32, %arg0 : i32, i32
  }
  func.func @transform_2(%arg0: i32) -> (i32, i32) {
    %c0_i32 = arith.constant 0 : i32
    %c0_i32_0 = arith.constant 0 : i32
    return %c0_i32, %arg0 : i32, i32
  }
  func.func @transform_3(%arg0: i32) -> (i32, i32) {
    %c0_i32 = arith.constant 0 : i32
    %c0_i32_0 = arith.constant 0 : i32
    return %c0_i32, %arg0 : i32, i32
  }
  func.func @transform_4(%arg0: i32) -> (i32, i32) {
    %c0_i32 = arith.constant 0 : i32
    %c0_i32_0 = arith.constant 0 : i32
    return %c0_i32, %arg0 : i32, i32
  }
}

</mosaic_0001>

<bundles_post_ra>
// kernel: tpu_custom_call.1
= control target key start
LH: loop header
LB: loop body
LE: loop exit
PB: predicated region body
PF: predicated region fallthrough
CT: control target
= control target key end

     0   :  { %9 = vsyncpa [#allocation3], 0  ;;  %s337_s0 = inlined_call_operand.hbm [shape: bf16[8,32], index: 0, kind: input, shape index: {}]   ;;  %s338_s1 = inlined_call_operand.hbm [shape: bf16[32,128], index: 1, kind: input, shape index: {}]   ;;  %s339_s2 = inlined_call_operand.vmem [shape: f32[1,128], index: 2, kind: input, shape index: {}]   ;;  %s340_s3 = inlined_call_operand.vmem [shape: f32[1,128], index: 3, kind: input, shape index: {}]   ;;  %s341_s4 = inlined_call_operand.hbm [shape: f32[8,128], index: 4, kind: output, shape index: {}]  }
   0x1   :  { %10 = vsyncpa [#allocation6], 0 }
   0x2   :  { %11 = vsyncpa [#allocation4], 0  ;;  %s256_s15 = smov [#allocation2]   ;;  %s257_s17 = smov [#allocation5]  }
   0x3   :  { %s18_s16 = sshll.u32 %s256_s15, 4  ;;  %s27_s18 = sshll.u32 %s257_s17, 4  ;;  %s19_s16 = int_to_ptr.vmem [resolvable:$true] %s18_s16  ;;  %s288_s18 = int_to_ptr.vmem [resolvable:$true] %s27_s18 }
   0x4   :  { %s184_s21 = scalar_lea.hbm %s337_s0, 64 }
   0x5   :  { %p185_p0 = scmp.ne.s32.totalorder %s337_s0, %s184_s21  ;;  %p188_p1 = scmp.lt.u32.totalorder %s184_s21, %s337_s0 }
   0x7   :  { %p190_p2 = pnand %p188_p1, %p185_p0 }
   0x9   :  { %193 = shalt.err (!%p190_p2)
}
   0xa   :  { %s194_s26 = scalar_lea.vmem %s19_s16, 64  ;;  %p199_p4 = scmp.lt.s32.totalorder %s19_s16, %s19_s16 }
   0xb   :  { %p195_p3 = scmp.ne.s32.totalorder %s19_s16, %s194_s26  ;;  %p200_p5 = scmp.lt.s32.totalorder %s194_s26, %s194_s26 }
   0xd   :  { %p201_p6 = por %p200_p5, %p199_p4 }
   0xf   :  { %p202_p7 = pnand %p201_p6, %p195_p3 }
  0x11   :  { %205 = shalt.err (!%p202_p7)
}
  0x12   :  { %21 = dma.hbm_to_vmem [thread:$0]  %s337_s0, 64, %s19_s16, [#allocation3]  }
  0x13   :  { %s206_s5 = scalar_lea.hbm %s338_s1, 256 }
  0x14   :  { %p207_p8 = scmp.ne.s32.totalorder %s338_s1, %s206_s5  ;;  %p210_p9 = scmp.lt.u32.totalorder %s206_s5, %s338_s1 }
  0x16   :  { %p212_p10 = pnand %p210_p9, %p207_p8 }
  0x18   :  { %215 = shalt.err (!%p212_p10)
}
  0x19   :  { %s216_s10 = scalar_lea.vmem %s288_s18, 256  ;;  %p221_p12 = scmp.lt.s32.totalorder %s288_s18, %s288_s18 }
  0x1a   :  { %p217_p11 = scmp.ne.s32.totalorder %s288_s18, %s216_s10  ;;  %p222_p13 = scmp.lt.s32.totalorder %s216_s10, %s216_s10 }
  0x1c   :  { %p223_p0 = por %p222_p13, %p221_p12 }
  0x1e   :  { %p224_p1 = pnand %p223_p0, %p217_p11 }
  0x20   :  { %227 = shalt.err (!%p224_p1)
}
  0x21   :  { %s258_s0 = smov 64   ;;  %s259_s11 = smov 4  }
  0x22   :  { %33 = dma.hbm_to_vmem [thread:$0]  %s338_s1, 256, %s288_s18, [#allocation6], %s258_s0, %s258_s0, %s259_s11  }
  0x23   :  { %250 = dma.done.wait [#allocation3], 64  }
  0x24   :  { %251 = vsyncadd [#allocation3], 4294967232 }
  0x25   :  { %252 = dma.done.wait [#allocation6], 256  }
  0x26   :  { %253 = vsyncadd [#allocation6], 4294967040  ;;  %v260_v0 = vmov 0.0   ;;  %vm261_vm0 = vmmov 0   ;;  %v180_v1 = vld [vmem:[#allocation5] sm:$0xff]   ;;  %v181_v2 = vld [vmem:[#allocation5 + $0x8] sm:$0xff]   ;;  %v127_v25 = vlaneseq }
  0x27   :  { %165 = vmatprep.subr.bf16.mxu0 %v260_v0  ;;  %169 = vmatprep.mubr.msk.bf16.mxu0 %vm261_vm0, %v260_v0  ;;  %v45_v3 = vld [vmem:[#allocation2] sm:$0xf]  ;;  %vm62_vm1 = vcmask 261120   ;;  %s262_s17 = smov [#allocation7]  }
  0x28   :  { %166 = vmatpush3.bf16.msra.mxu0 %v180_v1  ;;  %v128_v26 = vshrl.u32 %v127_v25, 7  ;;  %v125_v27 = vld [vmem:[%s339_s2] sm:$0x1]  ;;  %s148_s18 = sshll.u32 %s262_s17, 4  ;;  %s149_s18 = int_to_ptr.vmem [resolvable:$true] %s148_s18 }
  0x29   :  { %167 = vmatprep.subr.bf16.mxu0 %v260_v0  ;;  %v161_v32 = vld [vmem:[%s340_s3] ss:$0 sm:$0xff]  ;;  %s228_s19 = scalar_lea.vmem %s149_s18, 128  ;;  %p233_p3 = scmp.lt.s32.totalorder %s149_s18, %s149_s18 }
  0x2a   :  { %v129_v28 = vsub.s32 0, %v128_v26  ;;  %p229_p2 = scmp.ne.s32.totalorder %s149_s18, %s228_s19  ;;  %p234_p4 = scmp.lt.s32.totalorder %s228_s19, %s228_s19 }
  0x2c   :  { %168 = vmatpush3.bf16.msra.mxu0 %v181_v2  ;;  %p235_p5 = por %p234_p4, %p233_p3 }
  0x2e   :  { %p236_p6 = pnand %p235_p5, %p229_p2 }
  0x2f   :  { %170 = vmatmul.mubr.msk.bf16.vlgmr.msra.gmra.mrb[0].mxu0 %vm62_vm1, %v45_v3 }
 0x102   :  { %v100_v4 = vpop.f32.mrb[0].mxu0 }
 0x103   :  { %v106_v5 = vrot.slane %v100_v4, 4  ;;  %v171_v6 = vpop.f32.mrb[1].mxu0 }
 0x104   :  { %v103_v7 = vpop.f32.mrb[2].mxu0 }
 0x105   :  { %v107_v8 = vadd.f32 %v106_v5, %v100_v4  ;;  %v172_v9 = vpop.f32.mrb[3].mxu0 }
 0x107   :  { %v108_v10 = vrot.slane %v107_v8, 2 }
 0x109   :  { %v109_v11 = vadd.f32 %v108_v10, %v107_v8 }
 0x10b   :  { %v110_v12 = vrot.slane %v109_v11, 1 }
 0x10d   :  { %v111_v13 = vadd.f32 %v110_v12, %v109_v11 }
 0x10f   :  { %v113_v14 = vmul.f32 0.125, %v111_v13 }
 0x111   :  { %v114_v15 = vsub.f32 %v100_v4, %v113_v14 }
 0x113   :  { %v115_v16 = vmul.f32 %v114_v15, %v114_v15 }
 0x115   :  { %v116_v17 = vrot.slane %v115_v16, 4 }
 0x117   :  { %v117_v18 = vadd.f32 %v116_v17, %v115_v16 }
 0x119   :  { %v118_v19 = vrot.slane %v117_v18, 2 }
 0x11b   :  { %v119_v20 = vadd.f32 %v118_v19, %v117_v18 }
 0x11d   :  { %v120_v21 = vrot.slane %v119_v20, 1 }
 0x11f   :  { %v121_v22 = vadd.f32 %v120_v21, %v119_v20 }
 0x121   :  { %v122_v23 = vmul.f32 0.125, %v121_v22 }
 0x123   :  { %v123_v24 = vadd.f32 0.001, %v122_v23 }
 0x125   :  { %182 = vrsqrt.f32 %v123_v24 }
 0x12f   :  { %v183_v29 = vpop.eup %182 }
 0x130   :  { %v126_v30 = vmul.f32 %v183_v29, %v125_v27 }
 0x132   :  { %v130_v31 = vrot.slane %v126_v30, %v129_v28 }
 0x134   :  { %v131_v33 = vmul.f32 %v130_v31, %v114_v15 }
 0x136   :  { %v139_v34 = vadd.f32 %v161_v32, %v131_v33 }
 0x138   :  { %v140_v35 = vmax.f32 %v139_v34, 0.0 }
 0x13a   :  { %141 = vst [vmem:[#allocation7] sm:$0xff] %v140_v35 }
 0x13b   :  { %239 = shalt.err (!%p236_p6)
}
 0x13c   :  { %s240_s21 = scalar_lea.hbm %s341_s4, 128 }
 0x13d   :  { %p241_p7 = scmp.ne.s32.totalorder %s341_s4, %s240_s21  ;;  %p244_p8 = scmp.lt.u32.totalorder %s240_s21, %s341_s4 }
 0x13f   :  { %p246_p9 = pnand %p244_p8, %p241_p7 }
 0x141   :  { %249 = shalt.err (!%p246_p9)
}
 0x142   :  { %151 = dma.vmem_to_hbm [thread:$0]  %s149_s18, 128, %s341_s4, [#allocation4]  }
 0x143   :  { %254 = dma.done.wait [#allocation4], 128  }
 0x144   :  { %255 = vsyncadd [#allocation4], 4294967168 }
 0x145   :  { %155 = vsyncpa [#allocation3], 1 }
 0x146   :  { %156 = vsyncpa [#allocation6], 1 }
 0x147   :  { %157 = vsyncpa [#allocation4], 1 }

</bundles_post_ra>
